<compile_context>
chip_gen: v6e
topology: v6e:2x2x1
jax: 0.10.0
libtpu: 0.0.40
codegen_flags: <defaults>
</compile_context>

<pallas_src>
import jax
import jax.numpy as jnp
from jax import lax
from jax.experimental import pallas as pl
from jax.experimental.pallas import tpu as pltpu


def _round_up(n, m):
    return ((n + m - 1) // m) * m


def attention_layer_kernel(
    x_ref, adj_ref, y_ref, gcn_adj_ref,
    w_gcn_t_ref, w_tf_t_ref, v1_ref, v2_ref,
    z_ref, y_out_ref,
):
    f32 = jnp.float32

    # --- GraphConvolution: y_out = gcn_adj @ (y @ W_gcn.T) -------------------
    # w_gcn_t is already [L_in, L_pad] (pre-transposed + lane-padded on host).
    y_lin = jnp.dot(y_ref[...], w_gcn_t_ref[...],
                    preferred_element_type=f32)                    # [Ny, L_pad]
    y_out = jnp.dot(gcn_adj_ref[...], y_lin,
                    preferred_element_type=f32)                    # [Ny, L_pad]
    y_out_ref[...] = y_out.astype(y_out_ref.dtype)                 # full-lane store

    # --- x transformation: x_t = x @ W_tf.T (pre-transposed + padded) --------
    x_t = jnp.dot(x_ref[...], w_tf_t_ref[...],
                  preferred_element_type=f32)                      # [Nx, F_pad]

    # --- h_1 = h1(trans(y_out)) folded: h1 = y_out @ v1.T -> [Ny, 1] ---------
    h1 = lax.dot_general(y_out, v1_ref[...],
                         dimension_numbers=(((1,), (1,)), ((), ())),
                         preferred_element_type=f32)               # [Ny, 1]

    # --- h_2.T folded: h2_row = v2 @ x.T -> directly a [1, Nx] row vector ----
    h2_row = lax.dot_general(v2_ref[...], x_ref[...],
                             dimension_numbers=(((1,), (1,)), ((), ())),
                             preferred_element_type=f32)           # [1, Nx]

    # --- coefs = softmax(tanh(h2.T + h1) + adj, dim=1) ------------------------
    logits = jnp.tanh(h2_row + h1) + adj_ref[...]                  # [Ny, Nx]
    logits = logits - jnp.max(logits, axis=1, keepdims=True)
    e = jnp.exp(logits)
    s = jnp.sum(e, axis=1, keepdims=True)
    inv = pl.reciprocal(s, approx=True)        # EUP vrcp (frees the VALU)
    inv = inv * (2.0 - s * inv)                # one Newton step -> f32 accuracy
    coefs = e * inv

    # --- z = coefs @ x_t ------------------------------------------------------
    z = jnp.dot(coefs, x_t, preferred_element_type=f32)            # [Ny, F_pad]
    z_ref[...] = z.astype(z_ref.dtype)                             # full-lane store


def attention_layer(x, adj, y, gcn_adj, params):
    """Single fused Pallas kernel (one grid point; the whole working set is a
    few KiB so everything lives in VMEM).  Host side does the algebraic
    pre-folding / weight pre-transposition / lane padding once."""
    Nx, in_features = x.shape
    Ny, L_in = y.shape
    F_out = params["w_tf"].shape[0]
    L_out = params["w_gcn"].shape[0]
    F_pad = _round_up(F_out, 128)
    L_pad = _round_up(L_out, 128)

    f32 = jnp.float32
    # Pre-transposed, zero-padded-to-128-lanes weights (host-side, done once).
    w_gcn_t = jnp.zeros((L_in, L_pad), f32).at[:, :L_out].set(params["w_gcn"].T)
    w_tf_t = jnp.zeros((in_features, F_pad), f32).at[:, :F_out].set(params["w_tf"].T)
    # Folded projection vectors:
    #   h1 = y_out @ (w_h1 @ w_trans).T ;  h2 = x @ (w_h2 @ w_tf).T
    v1 = jnp.zeros((1, L_pad), f32).at[:, :L_out].set(params["w_h1"] @ params["w_trans"])
    v2 = (params["w_h2"] @ params["w_tf"]).astype(f32)             # [1, in_features]

    # Advisory cost estimate for the XLA scheduler.
    flops = 2 * (Ny * L_in * L_pad          # y @ w_gcn_t
                 + Ny * Ny * L_pad          # gcn_adj @ y_lin
                 + Nx * in_features * F_pad  # x @ w_tf_t
                 + Ny * L_pad               # h1
                 + Nx * in_features         # h2
                 + Ny * Nx * F_pad)         # coefs @ x_t
    flops += 4 * Ny * Nx                    # softmax elementwise
    transcendentals = 2 * Ny * Nx + Ny      # tanh + exp + reciprocal
    bytes_accessed = 4 * (x.size + adj.size + y.size + gcn_adj.size
                          + w_gcn_t.size + w_tf_t.size + v1.size + v2.size
                          + Ny * F_pad + Ny * L_pad)
    cost = pl.CostEstimate(flops=int(flops),
                           transcendentals=int(transcendentals),
                           bytes_accessed=int(bytes_accessed))

    vmem = pl.BlockSpec(memory_space=pltpu.MemorySpace.VMEM)
    z_pad, y_out_pad = pl.pallas_call(
        attention_layer_kernel,
        out_shape=(
            jax.ShapeDtypeStruct((Ny, F_pad), f32),
            jax.ShapeDtypeStruct((Ny, L_pad), f32),
        ),
        in_specs=[vmem] * 8,
        out_specs=(vmem, vmem),
        cost_estimate=cost,
    )(x, adj, y, gcn_adj, w_gcn_t, w_tf_t, v1, v2)

    # Slice the lane-padded outputs back to their true feature widths.
    return z_pad[:, :F_out], y_out_pad[:, :L_out]
    # TODO(synk): if this layer is invoked per-sample, batch B instances over a
    # grid=(B,) "parallel" axis (keeps weights resident, uses v7x's 2nd TC).


def _linear_init(key, out_size, in_size):
    # PyTorch nn.Linear default: U(-1/sqrt(in), 1/sqrt(in))
    bound = 1.0 / jnp.sqrt(jnp.float32(in_size))
    return jax.random.uniform(key, (out_size, in_size), jnp.float32,
                              minval=-bound, maxval=bound)


def _reference(x, adj, y, gcn_adj, p):
    # pure-JAX reference of the PyTorch forward (weight_dropout = 0)
    y_out = gcn_adj @ (y @ p["w_gcn"].T)
    x_t = x @ p["w_tf"].T
    h1 = (y_out @ p["w_trans"].T) @ p["w_h1"].T            # [Ny, 1]
    h2 = x_t @ p["w_h2"].T                                  # [Nx, 1]
    coefs = jax.nn.softmax(jnp.tanh(h2.T + h1) + adj, axis=1)
    z = coefs @ x_t
    return z, y_out


if __name__ == "__main__":
    # module hyperparameters
    in_features = 32
    out_features = 32
    label_features = 16
    label_out_features = 16
    Nx, Ny = 16, 8

    key = jax.random.PRNGKey(0)
    ks = jax.random.split(key, 9)

    params = {
        "w_gcn":   _linear_init(ks[0], label_out_features, label_features),
        "w_tf":    _linear_init(ks[1], out_features, in_features),
        "w_h1":    _linear_init(ks[2], 1, out_features),
        "w_h2":    _linear_init(ks[3], 1, out_features),
        "w_trans": _linear_init(ks[4], out_features, label_out_features),
    }

    x = jax.random.normal(ks[5], (Nx, in_features), jnp.float32)
    adj = jax.random.normal(ks[6], (Ny, Nx), jnp.float32)
    y = jax.random.normal(ks[7], (Ny, label_features), jnp.float32)
    gcn_adj = jax.random.normal(ks[8], (Ny, Ny), jnp.float32)

    z, y_out = attention_layer(x, adj, y, gcn_adj, params)
    jax.block_until_ready((z, y_out))

    z_ref, y_ref = _reference(x, adj, y, gcn_adj, params)
    assert jnp.allclose(z, z_ref, atol=1e-4, rtol=1e-4), "z mismatch"
    assert jnp.allclose(y_out, y_ref, atol=1e-4, rtol=1e-4), "y mismatch"

    print("KERNEL_OK")
</pallas_src>

<mosaic_0001>
module attributes {stable_mosaic.version = 11 : i64} {
  func.func @attention_layer_kernel(%arg0: memref<16x32xf32, #tpu.memory_space<vmem>>, %arg1: memref<8x16xf32, #tpu.memory_space<vmem>>, %arg2: memref<8x16xf32, #tpu.memory_space<vmem>>, %arg3: memref<8x8xf32, #tpu.memory_space<vmem>>, %arg4: memref<16x128xf32, #tpu.memory_space<vmem>>, %arg5: memref<32x128xf32, #tpu.memory_space<vmem>>, %arg6: memref<1x128xf32, #tpu.memory_space<vmem>>, %arg7: memref<1x32xf32, #tpu.memory_space<vmem>>, %arg8: memref<8x128xf32, #tpu.memory_space<vmem>>, %arg9: memref<8x128xf32, #tpu.memory_space<vmem>>) attributes {dimension_semantics = [], scalar_prefetch = 0 : i64, scratch_operands = 0 : i64, tpu.core_type = #tpu.core_type<tc>} {
    %c0 = arith.constant 0 : index
    %c0_0 = arith.constant 0 : index
    %0 = vector.load %arg2[%c0, %c0_0] : memref<8x16xf32, #tpu.memory_space<vmem>>, vector<8x16xf32>
    %c0_1 = arith.constant 0 : index
    %c0_2 = arith.constant 0 : index
    %1 = vector.load %arg4[%c0_1, %c0_2] : memref<16x128xf32, #tpu.memory_space<vmem>>, vector<16x128xf32>
    %cst = arith.constant dense<0.000000e+00> : vector<8x128xf32>
    %2 = tpu.matmul %0, %1, %cst {dimension_numbers = #tpu.dot_dimension_numbers<[1], [0], [0], [1], [0, 0, 1, 1], [], []>} : vector<8x16xf32>, vector<16x128xf32>, vector<8x128xf32> -> vector<8x128xf32>
    %c0_3 = arith.constant 0 : index
    %c0_4 = arith.constant 0 : index
    %3 = vector.load %arg3[%c0_3, %c0_4] : memref<8x8xf32, #tpu.memory_space<vmem>>, vector<8x8xf32>
    %cst_5 = arith.constant dense<0.000000e+00> : vector<8x128xf32>
    %4 = tpu.matmul %3, %2, %cst_5 {dimension_numbers = #tpu.dot_dimension_numbers<[1], [0], [0], [1], [0, 0, 1, 1], [], []>} : vector<8x8xf32>, vector<8x128xf32>, vector<8x128xf32> -> vector<8x128xf32>
    %c0_6 = arith.constant 0 : index
    %c0_7 = arith.constant 0 : index
    %5 = vector.load %arg9[%c0_6, %c0_7] : memref<8x128xf32, #tpu.memory_space<vmem>>, vector<8x128xf32>
    tpu.vector_store %arg9[%c0_6, %c0_7], %4 {strides = array<i32>} : memref<8x128xf32, #tpu.memory_space<vmem>>, vector<8x128xf32>,
    %c0_8 = arith.constant 0 : index
    %c0_9 = arith.constant 0 : index
    %6 = vector.load %arg0[%c0_8, %c0_9] : memref<16x32xf32, #tpu.memory_space<vmem>>, vector<16x32xf32>
    %c0_10 = arith.constant 0 : index
    %c0_11 = arith.constant 0 : index
    %7 = vector.load %arg5[%c0_10, %c0_11] : memref<32x128xf32, #tpu.memory_space<vmem>>, vector<32x128xf32>
    %cst_12 = arith.constant dense<0.000000e+00> : vector<16x128xf32>
    %8 = tpu.matmul %6, %7, %cst_12 {dimension_numbers = #tpu.dot_dimension_numbers<[1], [0], [0], [1], [0, 0, 1, 1], [], []>} : vector<16x32xf32>, vector<32x128xf32>, vector<16x128xf32> -> vector<16x128xf32>
    %c0_13 = arith.constant 0 : index
    %c0_14 = arith.constant 0 : index
    %9 = vector.load %arg6[%c0_13, %c0_14] : memref<1x128xf32, #tpu.memory_space<vmem>>, vector<1x128xf32>
    %cst_15 = arith.constant dense<0.000000e+00> : vector<8x1xf32>
    %10 = tpu.matmul %4, %9, %cst_15 {dimension_numbers = #tpu.dot_dimension_numbers<[1], [1], [0], [0], [0, 0, 1, 0], [], []>} : vector<8x128xf32>, vector<1x128xf32>, vector<8x1xf32> -> vector<8x1xf32>
    %c0_16 = arith.constant 0 : index
    %c0_17 = arith.constant 0 : index
    %11 = vector.load %arg7[%c0_16, %c0_17] : memref<1x32xf32, #tpu.memory_space<vmem>>, vector<1x32xf32>
    %c0_18 = arith.constant 0 : index
    %c0_19 = arith.constant 0 : index
    %12 = vector.load %arg0[%c0_18, %c0_19] : memref<16x32xf32, #tpu.memory_space<vmem>>, vector<16x32xf32>
    %cst_20 = arith.constant dense<0.000000e+00> : vector<1x16xf32>
    %13 = tpu.matmul %11, %12, %cst_20 {dimension_numbers = #tpu.dot_dimension_numbers<[1], [1], [0], [0], [0, 0, 1, 0], [], []>} : vector<1x32xf32>, vector<16x32xf32>, vector<1x16xf32> -> vector<1x16xf32>
    %14 = vector.broadcast %13 : vector<1x16xf32> to vector<8x16xf32>
    %15 = vector.broadcast %10 : vector<8x1xf32> to vector<8x16xf32>
    %16 = arith.addf %14, %15 : vector<8x16xf32>
    %17 = math.tanh %16 : vector<8x16xf32>
    %c0_21 = arith.constant 0 : index
    %c0_22 = arith.constant 0 : index
    %18 = vector.load %arg1[%c0_21, %c0_22] : memref<8x16xf32, #tpu.memory_space<vmem>>, vector<8x16xf32>
    %19 = arith.addf %17, %18 : vector<8x16xf32>
    %cst_23 = arith.constant dense<0xFF800000> : vector<8xf32>
    %20 = vector.multi_reduction <maximumf>, %19, %cst_23 [1] : vector<8x16xf32> to vector<8xf32>
    %21 = vector.shape_cast %20 : vector<8xf32> to vector<8x1xf32>
    %22 = vector.broadcast %21 : vector<8x1xf32> to vector<8x16xf32>
    %23 = arith.subf %19, %22 : vector<8x16xf32>
    %24 = math.exp %23 : vector<8x16xf32>
    %cst_24 = arith.constant dense<0.000000e+00> : vector<8xf32>
    %25 = vector.multi_reduction <add>, %24, %cst_24 [1] : vector<8x16xf32> to vector<8xf32>
    %26 = vector.shape_cast %25 : vector<8xf32> to vector<8x1xf32>
    %27 = tpu.reciprocal %26 {approx = true} : vector<8x1xf32> -> vector<8x1xf32>
    %28 = arith.mulf %26, %27 : vector<8x1xf32>
    %cst_25 = arith.constant 2.000000e+00 : f32
    %29 = vector.broadcast %cst_25 : f32 to vector<8x1xf32>
    %30 = arith.subf %29, %28 : vector<8x1xf32>
    %31 = arith.mulf %27, %30 : vector<8x1xf32>
    %32 = vector.broadcast %31 : vector<8x1xf32> to vector<8x16xf32>
    %33 = arith.mulf %24, %32 : vector<8x16xf32>
    %cst_26 = arith.constant dense<0.000000e+00> : vector<8x128xf32>
    %34 = tpu.matmul %33, %8, %cst_26 {dimension_numbers = #tpu.dot_dimension_numbers<[1], [0], [0], [1], [0, 0, 1, 1], [], []>} : vector<8x16xf32>, vector<16x128xf32>, vector<8x128xf32> -> vector<8x128xf32>
    %c0_27 = arith.constant 0 : index
    %c0_28 = arith.constant 0 : index
    %35 = vector.load %arg8[%c0_27, %c0_28] : memref<8x128xf32, #tpu.memory_space<vmem>>, vector<8x128xf32>
    tpu.vector_store %arg8[%c0_27, %c0_28], %34 {strides = array<i32>} : memref<8x128xf32, #tpu.memory_space<vmem>>, vector<8x128xf32>,
    return
  }
}

</mosaic_0001>

<bundles_post_ra>
// kernel: tpu_custom_call.1
= control target key start
LH: loop header
LB: loop body
LE: loop exit
PB: predicated region body
PF: predicated region fallthrough
CT: control target
= control target key end

     0   :  { %15 = vsyncpa [#allocation3], 0  ;;  %s940_s0 = inlined_call_operand.hbm [shape: f32[16,32], index: 0, kind: input, shape index: {}]   ;;  %s941_s1 = inlined_call_operand.hbm [shape: f32[8,16], index: 1, kind: input, shape index: {}]   ;;  %s942_s2 = inlined_call_operand.hbm [shape: f32[8,16], index: 2, kind: input, shape index: {}]   ;;  %s943_s3 = inlined_call_operand.hbm [shape: f32[8,8], index: 3, kind: input, shape index: {}]   ;;  %s944_s4 = inlined_call_operand.hbm [shape: f32[16,128], index: 4, kind: input, shape index: {}]   ;;  %s945_s5 = inlined_call_operand.hbm [shape: f32[32,128], index: 5, kind: input, shape index: {}]   ;;  %s946_s6 = inlined_call_operand.vmem [shape: f32[1,128], index: 6, kind: input, shape index: {}]   ;;  %s947_s7 = inlined_call_operand.vmem [shape: f32[1,32], index: 7, kind: input, shape index: {}]   ;;  %s948_s8 = inlined_call_operand.hbm [shape: f32[8,128], index: 8, kind: output, shape index: {0}]   ;;  %s949_s9 = inlined_call_operand.hbm [shape: f32[8,128], index: 9, kind: output, shape index: {1}]  }
   0x1   :  { %16 = vsyncpa [#allocation6], 0 }
   0x2   :  { %17 = vsyncpa [#allocation9], 0 }
   0x3   :  { %18 = vsyncpa [#allocation12], 0 }
   0x4   :  { %19 = vsyncpa [#allocation4], 0 }
   0x5   :  { %20 = vsyncpa [#allocation15], 0  ;;  %s815_s30 = smov [#allocation5]   ;;  %s816_s11 = smov [#allocation8]  }
   0x6   :  { %s39_s10 = sshll.u32 %s815_s30, 4  ;;  %s59_s12 = sshll.u32 %s816_s11, 4  ;;  %s40_s10 = int_to_ptr.vmem [resolvable:$true] %s39_s10  ;;  %s60_s12 = int_to_ptr.vmem [resolvable:$true] %s59_s12 }
   0x7   :  { %s651_s13 = scalar_lea.vmem %s40_s10, 128  ;;  %p656_p1 = scmp.lt.s32.totalorder %s40_s10, %s40_s10 }
   0x8   :  { %p652_p0 = scmp.ne.s32.totalorder %s40_s10, %s651_s13  ;;  %p657_p2 = scmp.lt.s32.totalorder %s651_s13, %s651_s13 }
   0xa   :  { %p658_p3 = por %p657_p2, %p656_p1 }
   0xc   :  { %p659_p4 = pnand %p658_p3, %p652_p0 }
   0xe   :  { %662 = shalt.err (!%p659_p4)
}
   0xf   :  { %42 = dma.hbm_to_vmem [thread:$0]  %s941_s1, 128, %s40_s10, [#allocation6]  }
  0x10   :  { %s671_s16 = scalar_lea.vmem %s60_s12, 128  ;;  %p676_p6 = scmp.lt.s32.totalorder %s60_s12, %s60_s12 }
  0x11   :  { %p672_p5 = scmp.ne.s32.totalorder %s60_s12, %s671_s16  ;;  %p677_p7 = scmp.lt.s32.totalorder %s671_s16, %s671_s16 }
  0x13   :  { %p678_p8 = por %p677_p7, %p676_p6 }
  0x15   :  { %p679_p9 = pnand %p678_p8, %p672_p5 }
  0x17   :  { %682 = shalt.err (!%p679_p9)
}
  0x18   :  { %62 = dma.hbm_to_vmem [thread:$0]  %s943_s3, 128, %s60_s12, [#allocation9]  }
  0x19   :  { %s817_s19 = smov [#allocation2]  }
  0x1a   :  { %s26_s20 = sshll.u32 %s817_s19, 4  ;;  %s27_s20 = int_to_ptr.vmem [resolvable:$true] %s26_s20 }
  0x1b   :  { %s691_s21 = scalar_lea.vmem %s27_s20, 256  ;;  %p696_p11 = scmp.lt.s32.totalorder %s27_s20, %s27_s20 }
  0x1c   :  { %p692_p10 = scmp.ne.s32.totalorder %s27_s20, %s691_s21  ;;  %p697_p12 = scmp.lt.s32.totalorder %s691_s21, %s691_s21 }
  0x1e   :  { %p698_p13 = por %p697_p12, %p696_p11 }
  0x20   :  { %p699_p0 = pnand %p698_p13, %p692_p10 }
  0x22   :  { %702 = shalt.err (!%p699_p0)
}
  0x23   :  { %s818_s1 = smov 128   ;;  %s819_s22 = smov 8  }
  0x24   :  { %32 = dma.hbm_to_vmem [thread:$0]  %s940_s0, 256, %s27_s20, [#allocation3], %s818_s1, %s818_s1, %s819_s22  }
  0x25   :  { %s820_s3 = smov [#allocation7]   ;;  %s821_s26 = smov [#allocation10]  }
  0x26   :  { %s49_s25 = sshll.u32 %s820_s3, 4  ;;  %s68_s27 = sshll.u32 %s821_s26, 4  ;;  %s50_s25 = int_to_ptr.vmem [resolvable:$true] %s49_s25  ;;  %s69_s27 = int_to_ptr.vmem [resolvable:$true] %s68_s27 }
  0x27   :  { %s711_s28 = scalar_lea.vmem %s50_s25, 128  ;;  %p716_p2 = scmp.lt.s32.totalorder %s50_s25, %s50_s25 }
  0x28   :  { %p712_p1 = scmp.ne.s32.totalorder %s50_s25, %s711_s28  ;;  %p717_p3 = scmp.lt.s32.totalorder %s711_s28, %s711_s28 }
  0x2a   :  { %p718_p4 = por %p717_p3, %p716_p2 }
  0x2c   :  { %p719_p5 = pnand %p718_p4, %p712_p1 }
  0x2e   :  { %722 = shalt.err (!%p719_p5)
}
  0x2f   :  { %52 = dma.hbm_to_vmem [thread:$0]  %s942_s2, 128, %s50_s25, [#allocation6]  }
  0x30   :  { %s731_s10 = scalar_lea.vmem %s69_s27, 256  ;;  %p736_p7 = scmp.lt.s32.totalorder %s69_s27, %s69_s27 }
  0x31   :  { %p732_p6 = scmp.ne.s32.totalorder %s69_s27, %s731_s10  ;;  %p737_p8 = scmp.lt.s32.totalorder %s731_s10, %s731_s10 }
  0x33   :  { %p738_p9 = por %p737_p8, %p736_p7 }
  0x35   :  { %p739_p10 = pnand %p738_p9, %p732_p6 }
  0x37   :  { %742 = shalt.err (!%p739_p10)
}
  0x38   :  { %74 = dma.hbm_to_vmem [thread:$0]  %s944_s4, 256, %s69_s27, [#allocation9], %s818_s1, %s818_s1, %s819_s22  }
  0x39   :  { %s822_s12 = smov [#allocation11]  }
  0x3a   :  { %s80_s13 = sshll.u32 %s822_s12, 4  ;;  %s81_s13 = int_to_ptr.vmem [resolvable:$true] %s80_s13 }
  0x3b   :  { %s751_s14 = scalar_lea.vmem %s81_s13, 512  ;;  %p756_p12 = scmp.lt.s32.totalorder %s81_s13, %s81_s13 }
  0x3c   :  { %p752_p11 = scmp.ne.s32.totalorder %s81_s13, %s751_s14  ;;  %p757_p13 = scmp.lt.s32.totalorder %s751_s14, %s751_s14 }
  0x3e   :  { %p758_p0 = por %p757_p13, %p756_p12 }
  0x40   :  { %p759_p1 = pnand %p758_p0, %p752_p11 }
  0x42   :  { %762 = shalt.err (!%p759_p1)
}
  0x43   :  { %86 = dma.hbm_to_vmem [thread:$0]  %s945_s5, 512, %s81_s13, [#allocation12], %s818_s1, %s818_s1, %s819_s22  }
  0x44   :  { %803 = dma.done.wait [#allocation3], 256  }
  0x45   :  { %804 = vsyncadd [#allocation3], 4294967040 }
  0x46   :  { %805 = dma.done.wait [#allocation6], 256  }
  0x47   :  { %806 = vsyncadd [#allocation6], 4294967040 }
  0x48   :  { %807 = dma.done.wait [#allocation9], 384  }
  0x49   :  { %808 = vsyncadd [#allocation9], 4294966912 }
  0x4a   :  { %809 = dma.done.wait [#allocation12], 512  }
  0x4b   :  { %810 = vsyncadd [#allocation12], 4294966784  ;;  %v823_v0 = vmov 0.0   ;;  %vm824_vm0 = vmmov 0   ;;  %v111_v1 = vld [vmem:[#allocation10 + $0x8] sm:$0xff]  ;;  %v110_v2 = vld [vmem:[#allocation10] sm:$0xff]  ;;  %v434_v20 = vlaneseq }
  0x4c   :  { %588 = vmatprep.subr.mxu0 %v823_v0  ;;  %592 = vmatprep.mubr.msk.f32.mxu0 %vm824_vm0, %v823_v0  ;;  %v109_v3 = vld [vmem:[#allocation7] sm:$0xff]  ;;  %vm112_vm1 = vcmask 130048   ;;  %v263_v4 = vld [vmem:[#allocation2 + $0x8] sm:$0xff]  ;;  %vm268_vm2 = vcmask 261120   ;;  %v262_v5 = vld [vmem:[#allocation2] sm:$0xff]  ;;  %vm187_vm3 = vcmask 64512  }
  0x4d   :  { %595 = vmatprep.subr.mxu1 %v823_v0  ;;  %597 = vmatprep.mubr.msk.f32.mxu1 %vm824_vm0, %v823_v0  ;;  %v360_v6 = vld [vmem:[%s947_s7] sm:$0x1]  ;;  %v267_v16 = vld [vmem:[#allocation11 + $0x18] sm:$0xff]  ;;  %v266_v17 = vld [vmem:[#allocation11 + $0x10] sm:$0xff]  ;;  %v435_v21 = vshrl.u32 %v434_v20, 7 }
  0x4e   :  { %589 = vmatpush3.msra.mxu0 %v111_v1  ;;  %v186_v7 = vld [vmem:[#allocation8] sm:$0xff]  ;;  %v264_v19 = vld [vmem:[#allocation11] sm:$0xff]  ;;  %v440_v26 = vld [vmem:[#allocation5] sm:$0xff] }
  0x4f   :  { %590 = vmatprep.subr.mxu0 %v823_v0  ;;  %v566_v12 = vld [vmem:[%s946_s6] ss:$0 sm:$0xff]  ;;  %v436_v22 = vsub.s32 0, %v435_v21  ;;  %s825_s6 = smov [#allocation14]  }
  0x50   :  { %591 = vmatpush3.msra.mxu0 %v110_v2  ;;  %v265_v18 = vld [vmem:[#allocation11 + $0x8] sm:$0xff]  ;;  %s546_s7 = sshll.u32 %s825_s6, 4  ;;  %s547_s7 = int_to_ptr.vmem [resolvable:$true] %s546_s7 }
  0x51   :  { %593 = vmatmul.mubr.msk.f32.vlgmr.msra.gmra.mxu0 %vm112_vm1, %v109_v3  ;;  %611 = vmatprep.subr.mxu0 %v823_v0  ;;  %s763_s18 = scalar_lea.vmem %s547_s7, 128  ;;  %p768_p3 = scmp.lt.s32.totalorder %s547_s7, %s547_s7 }
  0x52   :  { %615 = vmatprep.mubr.msk.f32.mxu0 %vm824_vm0, %v823_v0  ;;  %612 = vmatpush3.xpose.msk.msra.mxu0 %vm268_vm2, %v263_v4  ;;  %p764_p2 = scmp.ne.s32.totalorder %s547_s7, %s763_s18  ;;  %p769_p4 = scmp.lt.s32.totalorder %s763_s18, %s763_s18 }
  0x53   :  { %613 = vmatprep.subr.mxu0 %v823_v0 }
  0x54   :  { %p770_p5 = por %p769_p4, %p768_p3 }
  0x56   :  { %614 = vmatpush3.xpose.msk.msra.mxu0 %vm268_vm2, %v262_v5  ;;  %p771_p6 = pnand %p770_p5, %p764_p2 }
  0x59   :  { %616 = vmatmul.mubr.msk.f32.vlgmr.msra.gmra.mxu0 %vm268_vm2, %v360_v6 }
 0x111   :  { %v182_v8 = vpop.f32.mrf.mxu0 }
 0x112   :  { %596 = vmatpush3.msra.mxu1 %v182_v8 }
 0x113   :  { %v594_v9 = vpop.f32.mrf.mxu0  ;;  %598 = vmatmul.mubr.msk.f32.vlgmr.msra.gmra.mxu1 %vm187_vm3, %v186_v7  ;;  %600 = vmatprep.subr.mxu1 %v267_v16 }
 0x114   :  { %608 = vmatprep.mubr.msk.f32.mxu1 %vm268_vm2, %v262_v5  ;;  %601 = vmatpush3.msra.mxu1 %v267_v16 }
 0x115   :  { %602 = vmatprep.subr.mxu1 %v266_v17 }
 0x116   :  { %603 = vmatpush3.msra.mxu1 %v266_v17 }
 0x117   :  { %604 = vmatprep.subr.mxu1 %v265_v18 }
 0x118   :  { %605 = vmatpush3.msra.mxu1 %v265_v18 }
 0x119   :  { %v430_v10 = vpop.f32.mrf.mxu0  ;;  %606 = vmatprep.subr.mxu1 %v264_v19 }
 0x11a   :  { %607 = vmatpush3.msra.mxu1 %v264_v19  ;;  %v437_v23 = vrot.slane %v430_v10, %v436_v22 }
 0x11b   :  { %v617_v11 = vpop.f32.mrf.mxu0  ;;  %609 = vmatmul.mubr.msk.f32.vlgmr.msra.gmra.mxu1 %vm268_vm2, %v263_v4  ;;  %618 = vmatprep.subr.mxu1 %v823_v0 }
 0x11c   :  { %622 = vmatprep.mubr.msk.f32.mxu1 %vm824_vm0, %v823_v0 }
 0x1d3   :  { %v257_v13 = vpop.f32.mrf.mxu1 }
 0x1d4   :  { %261 = vst [vmem:[#allocation14] sm:$0xff] %v257_v13  ;;  %v357_v14 = vmul.f32 %v566_v12, %v257_v13 }
 0x1d5   :  { %v599_v15 = vpop.f32.mrf.mxu1 }
 0x1d6   :  { %358 = vadd.xlane.f32.xlu0 %v357_v14 }
 0x1db   :  { %v610_v35 = vpop.f32.mrf.mxu1 }
 0x1dc   :  { %619 = vmatpush3.msra.mxu1 %v610_v35 }
 0x1dd   :  { %v341_v36 = vpop.f32.mrf.mxu1  ;;  %620 = vmatprep.subr.mxu1 %v823_v0 }
 0x1de   :  { %621 = vmatpush3.msra.mxu1 %v341_v36 }
 0x25f   :  { %v359_v24 = vpop.xlane.xlu0 %358 }
 0x260   :  { %v438_v25 = vadd.f32 %v437_v23, %v359_v24 }
 0x262   :  { %637 = vtanh.f32 %v438_v25 }
 0x26f   :  { %v638_v27 = vpop.eup %637 }
 0x270   :  { %v441_v28 = vadd.f32 %v638_v27, %v440_v26 }
 0x272   :  { %v442_v29 = vsel %vm112_vm1, %v441_v28, -inf }
 0x273   :  { %443 = vmax.xlane.f32.xlu0 %v442_v29 }
 0x2fc   :  { %v444_v30 = vpop.xlane.xlu0 %443 }
 0x2fd   :  { %v445_v31 = vsub.f32 %v441_v28, %v444_v30 }
 0x2ff   :  { %v446_v32 = vmul.f32 1.442695, %v445_v31 }
 0x301   :  { %639 = vpow2.f32 %v446_v32 }
 0x30e   :  { %v640_v33 = vpop.eup %639 }
 0x30f   :  { %v448_v34 = vsel %vm112_vm1, %v640_v33, 0.0 }
 0x310   :  { %449 = vadd.xlane.f32.xlu1 %v448_v34 }
 0x399   :  { %v450_v37 = vpop.xlane.xlu1 %449 }
 0x39a   :  { %641 = vrcp.f32 %v450_v37 }
 0x3a7   :  { %v642_v38 = vpop.eup %641 }
 0x3a8   :  { %v452_v39 = vmul.f32 %v642_v38, %v450_v37 }
 0x3aa   :  { %v453_v40 = vsub.f32 2.0, %v452_v39 }
 0x3ac   :  { %v454_v41 = vmul.f32 %v642_v38, %v453_v40 }
 0x3ae   :  { %v455_v42 = vmul.f32 %v640_v33, %v454_v41 }
 0x3b0   :  { %623 = vmatmul.mubr.msk.f32.vlgmr.msra.gmra.mxu1 %vm112_vm1, %v455_v42 }
 0x3b1   :  { %774 = shalt.err (!%p771_p6)
}
 0x3b2   :  { %549 = dma.vmem_to_hbm [thread:$0]  %s547_s7, 128, %s949_s9, [#allocation15]  }
 0x3b3   :  { %s826_s21 = smov [#allocation13]  }
 0x3b4   :  { %s536_s1 = sshll.u32 %s826_s21, 4  ;;  %s537_s1 = int_to_ptr.vmem [resolvable:$true] %s536_s1 }
 0x3b5   :  { %s783_s22 = scalar_lea.vmem %s537_s1, 128  ;;  %p788_p8 = scmp.lt.s32.totalorder %s537_s1, %s537_s1 }
 0x3b6   :  { %p784_p7 = scmp.ne.s32.totalorder %s537_s1, %s783_s22  ;;  %p789_p9 = scmp.lt.s32.totalorder %s783_s22, %s783_s22 }
 0x3b8   :  { %p790_p10 = por %p789_p9, %p788_p8 }
 0x3ba   :  { %p791_p11 = pnand %p790_p10, %p784_p7 }
 0x470   :  { %v525_v43 = vpop.f32.mrf.mxu1 }
 0x471   :  { %529 = vst [vmem:[#allocation13] sm:$0xff] %v525_v43 }
 0x472   :  { %v624_v44 = vpop.f32.mrf.mxu1 }
 0x473   :  { %794 = shalt.err (!%p791_p11)
}
 0x474   :  { %539 = dma.vmem_to_hbm [thread:$0]  %s537_s1, 128, %s948_s8, [#allocation4]  }
 0x475   :  { %811 = dma.done.wait [#allocation4], 128  }
 0x476   :  { %812 = vsyncadd [#allocation4], 4294967168 }
 0x477   :  { %813 = dma.done.wait [#allocation15], 128  }
 0x478   :  { %814 = vsyncadd [#allocation15], 4294967168 }
 0x479   :  { %556 = vsyncpa [#allocation3], 1 }
 0x47a   :  { %557 = vsyncpa [#allocation6], 1 }
 0x47b   :  { %558 = vsyncpa [#allocation9], 1 }
 0x47c   :  { %559 = vsyncpa [#allocation12], 1 }
 0x47d   :  { %560 = vsyncpa [#allocation4], 1 }
 0x47e   :  { %561 = vsyncpa [#allocation15], 1 }

</bundles_post_ra>
